<compile_context>
chip_gen: v7x
topology: tpu7x:2x2x1
jax: 0.10.0
libtpu: 0.0.40
codegen_flags: <defaults>
</compile_context>

<pallas_src>
import math

import jax
import jax.numpy as jnp
from jax import lax
from jax.experimental import pallas as pl
from jax.experimental.pallas import tpu as pltpu


def _round_up(x, m):
    return ((x + m - 1) // m) * m


def _layernorm(x, gamma, beta, eps=1e-5):
    mean = jnp.mean(x, axis=-1, keepdims=True)
    var = jnp.mean((x - mean) ** 2, axis=-1, keepdims=True)
    return (x - mean) * lax.rsqrt(var + eps) * gamma + beta


def _vmem_limit_bytes():
    # ~100 MiB on v5e/v6e (128 MiB physical), ~56 MiB on v7x (64 MiB physical).
    try:
        cap = int(pltpu.get_tpu_info().vmem_capacity_bytes)
    except Exception:
        return None
    if cap < (32 << 20):
        return None
    return min(cap - (8 << 20), 100 << 20)


# --------------------------------------------------------------------------------------
# Projection kernel: y = (x @ W + b) * scale   (W already bf16; bf16 output)
# --------------------------------------------------------------------------------------
def _make_proj_kernel(scale):
    def kernel(x_ref, w_ref, b_ref, o_ref):
        x = x_ref[0].astype(jnp.bfloat16)                       # (tr, E_in)
        y = jnp.dot(x, w_ref[...], preferred_element_type=jnp.float32) + b_ref[0]
        if scale != 1.0:                                        # fold 1/sqrt(hs) into Q
            y = y * scale
        o_ref[0] = y.astype(o_ref.dtype)
    return kernel


def _linear_proj(x, w_bf16, b, *, scale=1.0, row_tile=256, out_dtype=jnp.bfloat16):
    B, L, E_in = x.shape
    E_out = w_bf16.shape[1]
    tr = min(row_tile, _round_up(L, 8))
    L_pad = _round_up(L, tr)
    if L_pad != L:
        x = jnp.pad(x, ((0, 0), (0, L_pad - L), (0, 0)))
    nr = L_pad // tr

    # Grid-invariant operands: single-buffered (never re-fetched, half the VMEM).
    inv = lambda shape: pl.BlockSpec(shape, lambda bb, i: (0, 0),
                                     pipeline_mode=pl.Buffered(1))

    cost = pl.CostEstimate(
        flops=2 * B * L_pad * E_in * E_out,
        transcendentals=0,
        bytes_accessed=4 * B * L_pad * E_in + 2 * E_in * E_out + 2 * B * L_pad * E_out)

    out = pl.pallas_call(
        _make_proj_kernel(scale),
        out_shape=jax.ShapeDtypeStruct((B, L_pad, E_out), out_dtype),
        grid_spec=pltpu.PrefetchScalarGridSpec(
            num_scalar_prefetch=0,
            grid=(B, nr),
            in_specs=[
                pl.BlockSpec((1, tr, E_in), lambda bb, i: (bb, i, 0)),
                inv((E_in, E_out)),
                inv((1, E_out)),
            ],
            out_specs=pl.BlockSpec((1, tr, E_out), lambda bb, i: (bb, i, 0)),
        ),
        compiler_params=pltpu.CompilerParams(
            dimension_semantics=("parallel", "parallel"),
            vmem_limit_bytes=_vmem_limit_bytes()),
        cost_estimate=cost,
    )(x, w_bf16, b)
    return out[:, :L, :] if L_pad != L else out


# --------------------------------------------------------------------------------------
# Main kernel: flash-style attention over (b, q-tile, k-tile) + head merge + LN1 + FFN + LN2
# --------------------------------------------------------------------------------------
def _make_attn_ffn_kernel(nhead, head_size, nhid, tq, tk, lk_valid, lk_pad, nhid_chunk):
    E = nhead * head_size
    ck = min(nhid_chunk, nhid)
    if nhid % ck:
        ck = nhid
    n_ch = nhid // ck
    need_mask = lk_pad != lk_valid          # static: only emit masking code when padded

    def kernel(qh_ref, kh_ref, vh_ref,
               w1_ref, b1_ref, w2_ref, b2_ref,
               g1_ref, be1_ref, g2_ref, be2_ref,
               out_ref,
               m_sc, l_sc, acc_sc):
        k_step = pl.program_id(2)

        @pl.when(k_step == 0)
        def _init():
            m_sc[...] = jnp.full((nhead, tq, 1), -jnp.inf, jnp.float32)
            l_sc[...] = jnp.zeros((nhead, tq, 1), jnp.float32)
            acc_sc[...] = jnp.zeros((nhead, tq, head_size), jnp.float32)

        qh = qh_ref[0]      # (H, tq, hs) bf16, already scaled by 1/sqrt(hs)
        kh = kh_ref[0]      # (H, tk, hs) bf16
        vh = vh_ref[0]      # (H, tk, hs) bf16

        # scores[h, q, k] = <qh[h,q,:], kh[h,k,:]>  — contraction over last dims, so the MXU
        # transposes implicitly; bf16 operands, f32 accumulation.
        s = lax.dot_general(qh, kh, (((2,), (2,)), ((0,), (0,))),
                            preferred_element_type=jnp.float32)          # (H, tq, tk)
        if need_mask:   # mask zero-padded key rows of the last Lk tile
            col = k_step * tk + lax.broadcasted_iota(jnp.int32, (nhead, tq, tk), 2)
            s = jnp.where(col < lk_valid, s, -1e9)

        # Online softmax accumulation (m/l/acc persist across the nk grid axis).
        m_prev = m_sc[...]
        m_new = jnp.maximum(m_prev, jnp.max(s, axis=-1, keepdims=True))
        alpha = jnp.exp(m_prev - m_new)
        p = jnp.exp(s - m_new)
        l_sc[...] = alpha * l_sc[...] + jnp.sum(p, axis=-1, keepdims=True)
        acc_sc[...] = alpha * acc_sc[...] + lax.dot_general(
            p.astype(jnp.bfloat16), vh, (((2,), (1,)), ((0,), (0,))),
            preferred_element_type=jnp.float32)                          # (H, tq, hs)
        m_sc[...] = m_new

        @pl.when(k_step == pl.num_programs(2) - 1)
        def _finalize():
            ctx = acc_sc[...] / l_sc[...]            # exact normalize (once per q tile)
            # Merge heads back to (tq, E).  TODO(synk): use pltpu.einshape at hs==128.
            context = jnp.concatenate([ctx[h] for h in range(nhead)], axis=-1)

            # Reference applies norm1 directly to the attention output (no residual here).
            x = _layernorm(context, g1_ref[0], be1_ref[0])
            x16 = x.astype(jnp.bfloat16)

            # FFN, chunked over nhid so h1's live range is bounded (vreg/VMEM pressure).
            ff = jnp.zeros((tq, E), jnp.float32)
            for c in range(n_ch):
                w1c = w1_ref[c * ck:(c + 1) * ck, :]               # (ck, E) bf16
                b1c = b1_ref[0, c * ck:(c + 1) * ck]               # (ck,)   f32
                h1 = lax.dot_general(x16, w1c, (((1,), (1,)), ((), ())),
                                     preferred_element_type=jnp.float32) + b1c
                h1 = jnp.maximum(h1, 0.0).astype(jnp.bfloat16)     # (tq, ck)
                ff = ff + jnp.dot(h1, w2_ref[c * ck:(c + 1) * ck, :],
                                  preferred_element_type=jnp.float32)
            ff = ff + b2_ref[0]

            y = _layernorm(x + ff, g2_ref[0], be2_ref[0])
            out_ref[0] = y.astype(out_ref.dtype)

    return kernel


def transformer_layer(query, key_value, params, nhead, *,
                      q_tile=256, k_tile=512, nhid_chunk=1024):
    B, Lq, E = query.shape
    _, Lk, _ = key_value.shape
    assert E % nhead == 0, "embed_dim must be divisible by num_heads"
    hs = E // nhead
    nhid = params["w1"].shape[0]
    scale = 1.0 / math.sqrt(hs)

    # bf16 weight feeds for the MXU (biases / LN params stay f32).
    bf16 = jnp.bfloat16
    wq, wk, wv = (params[n].astype(bf16) for n in ("wq", "wk", "wv"))
    w1, w2 = params["w1"].astype(bf16), params["w2"].astype(bf16)

    # 1) Hoisted projections: each token projected exactly once.
    q_p = _linear_proj(query, wq, params["bq"], scale=scale)
    k_p = _linear_proj(key_value, wk, params["bk"])
    v_p = _linear_proj(key_value, wv, params["bv"])

    # 2) Head split in the wrapper (layout plumbing; keeps per-head relayouts out of kernel).
    def split_heads(x, L):
        return x.reshape(B, L, nhead, hs).transpose(0, 2, 1, 3)   # (B, H, L, hs)
    qh, kh, vh = split_heads(q_p, Lq), split_heads(k_p, Lk), split_heads(v_p, Lk)

    # 3) Tiling.  B and q-tiles are "parallel" grid axes (v7x megacore), k-tiles "arbitrary".
    tq = min(q_tile, _round_up(Lq, 8)); Lq_pad = _round_up(Lq, tq); nq = Lq_pad // tq
    tk = min(k_tile, _round_up(Lk, 8)); Lk_pad = _round_up(Lk, tk); nk = Lk_pad // tk
    if Lq_pad != Lq:
        qh = jnp.pad(qh, ((0, 0), (0, 0), (0, Lq_pad - Lq), (0, 0)))
    if Lk_pad != Lk:
        kh = jnp.pad(kh, ((0, 0), (0, 0), (0, Lk_pad - Lk), (0, 0)))
        vh = jnp.pad(vh, ((0, 0), (0, 0), (0, Lk_pad - Lk), (0, 0)))

    kernel = _make_attn_ffn_kernel(nhead, hs, nhid, tq, tk, Lk, Lk_pad, nhid_chunk)

    # Grid-invariant weights: single-buffered (Buffered(1)) — no re-fetch, half the VMEM.
    inv = lambda shape: pl.BlockSpec(shape, lambda b, i, k: (0, 0),
                                     pipeline_mode=pl.Buffered(1))

    flops = 4 * B * nq * nk * nhead * tq * tk * hs + 4 * B * nq * tq * E * nhid
    bytes_accessed = (2 * B * nq * nhead * tq * hs            # q tiles (bf16)
                      + 4 * B * nq * nk * nhead * tk * hs     # k+v tiles incl. re-reads
                      + 4 * nhid * E + 4 * (nhid + 6 * E)     # weights + small params
                      + 4 * B * Lq_pad * E)                   # output
    cost = pl.CostEstimate(flops=flops,
                           transcendentals=B * nq * nk * nhead * tq * tk,
                           bytes_accessed=bytes_accessed)

    out = pl.pallas_call(
        kernel,
        out_shape=jax.ShapeDtypeStruct((B, Lq_pad, E), query.dtype),
        grid_spec=pltpu.PrefetchScalarGridSpec(
            num_scalar_prefetch=0,
            grid=(B, nq, nk),
            in_specs=[
                pl.BlockSpec((1, nhead, tq, hs), lambda b, i, k: (b, 0, i, 0)),
                pl.BlockSpec((1, nhead, tk, hs), lambda b, i, k: (b, 0, k, 0)),
                pl.BlockSpec((1, nhead, tk, hs), lambda b, i, k: (b, 0, k, 0)),
                inv((nhid, E)), inv((1, nhid)),     # W1, b1
                inv((nhid, E)), inv((1, E)),        # W2, b2
                inv((1, E)), inv((1, E)),           # norm1 gamma, beta
                inv((1, E)), inv((1, E)),           # norm2 gamma, beta
            ],
            out_specs=pl.BlockSpec((1, tq, E), lambda b, i, k: (b, i, 0)),
            scratch_shapes=[pltpu.VMEM((nhead, tq, 1), jnp.float32),    # m
                            pltpu.VMEM((nhead, tq, 1), jnp.float32),    # l
                            pltpu.VMEM((nhead, tq, hs), jnp.float32)],  # acc
        ),
        compiler_params=pltpu.CompilerParams(
            dimension_semantics=("parallel", "parallel", "arbitrary"),
            vmem_limit_bytes=_vmem_limit_bytes()),
        cost_estimate=cost,
    )(qh, kh, vh, w1, params["b1"], w2, params["b2"],
      params["g1"], params["be1"], params["g2"], params["be2"])

    return out[:, :Lq, :] if Lq_pad != Lq else out


# --------------------------------------------------------------------------------------
# Pure-JAX reference mirroring the PyTorch forward (mask=None, dropout=0).
# --------------------------------------------------------------------------------------
def reference_transformer_layer(query, key_value, params, nhead):
    B, Lq, E = query.shape
    hs = E // nhead
    Q = query @ params["wq"] + params["bq"][0]
    K = key_value @ params["wk"] + params["bk"][0]
    V = key_value @ params["wv"] + params["bv"][0]

    def split(x):
        return x.reshape(x.shape[0], x.shape[1], nhead, hs).transpose(0, 2, 1, 3)

    Qh, Kh, Vh = split(Q), split(K), split(V)
    scores = jnp.einsum("bhqd,bhkd->bhqk", Qh, Kh) / math.sqrt(hs)
    attn = jax.nn.softmax(scores, axis=-1)
    ctx = jnp.einsum("bhqk,bhkd->bhqd", attn, Vh)
    ctx = ctx.transpose(0, 2, 1, 3).reshape(B, Lq, E)
    x = _layernorm(ctx, params["g1"][0], params["be1"][0])
    h = jnp.maximum(x @ params["w1"].T + params["b1"][0], 0.0)
    ff = h @ params["w2"] + params["b2"][0]
    return _layernorm(x + ff, params["g2"][0], params["be2"][0])


if __name__ == "__main__":
    B, Lq, Lk = 2, 8, 8
    E, nhead, nhid = 32, 4, 64

    key = jax.random.PRNGKey(0)
    keys = jax.random.split(key, 12)

    def init_w(k, shape, fan_in):
        bound = 1.0 / math.sqrt(fan_in)
        return jax.random.uniform(k, shape, jnp.float32, -bound, bound)

    params = {
        "wq": init_w(keys[0], (E, E), E),  "bq": init_w(keys[1], (1, E), E),
        "wk": init_w(keys[2], (E, E), E),  "bk": init_w(keys[3], (1, E), E),
        "wv": init_w(keys[4], (E, E), E),  "bv": init_w(keys[5], (1, E), E),
        "w1": init_w(keys[6], (nhid, E), E),    "b1": init_w(keys[7], (1, nhid), E),
        "w2": init_w(keys[8], (nhid, E), nhid), "b2": init_w(keys[9], (1, E), nhid),
        "g1": jnp.ones((1, E), jnp.float32),  "be1": jnp.zeros((1, E), jnp.float32),
        "g2": jnp.ones((1, E), jnp.float32),  "be2": jnp.zeros((1, E), jnp.float32),
    }

    query = jax.random.normal(keys[10], (B, Lq, E), jnp.float32)
    key_value = jax.random.normal(keys[11], (B, Lk, E), jnp.float32)

    out = transformer_layer(query, key_value, params, nhead)
    out = jax.block_until_ready(out)

    ref = reference_transformer_layer(query, key_value, params, nhead)
    assert out.shape == (B, Lq, E)
    # Tolerance accounts for bf16 MXU feeds (weights + activations rounded to bf16,
    # f32 accumulation); softmax normalization itself uses an exact divide.
    assert jnp.allclose(out, ref, atol=3e-2, rtol=3e-2), "mismatch vs pure-JAX reference"

    print("KERNEL_OK")
</pallas_src>

<mosaic_0001>
module attributes {stable_mosaic.version = 11 : i64} {
  func.func @kernel(%arg0: i32, %arg1: i32, %arg2: memref<1x8x32xf32, #tpu.memory_space<vmem>>, %arg3: memref<32x32xbf16, #tpu.memory_space<vmem>>, %arg4: memref<1x32xf32, #tpu.memory_space<vmem>>, %arg5: memref<1x8x32xbf16, #tpu.memory_space<vmem>>) attributes {dimension_semantics = [#tpu.dimension_semantics<parallel>, #tpu.dimension_semantics<parallel>], iteration_bounds = array<i64: 2, 1>, scalar_prefetch = 0 : i64, scratch_operands = 0 : i64, tpu.core_type = #tpu.core_type<tc>, window_params = [{transform_indices = @transform_0, window_bounds = array<i64: 1, 8, 32>}, {pipeline_mode = #tpu.pipeline_mode<synchronous>, transform_indices = @transform_1, window_bounds = array<i64: 32, 32>}, {pipeline_mode = #tpu.pipeline_mode<synchronous>, transform_indices = @transform_2, window_bounds = array<i64: 1, 32>}, {transform_indices = @transform_3, window_bounds = array<i64: 1, 8, 32>}]} {
    %c0 = arith.constant 0 : index
    %c0_0 = arith.constant 0 : index
    %c0_1 = arith.constant 0 : index
    %0 = vector.load %arg2[%c0, %c0_0, %c0_1] : memref<1x8x32xf32, #tpu.memory_space<vmem>>, vector<1x8x32xf32>
    %1 = vector.shape_cast %0 : vector<1x8x32xf32> to vector<8x32xf32>
    %2 = arith.truncf %1 : vector<8x32xf32> to vector<8x32xbf16>
    %c0_2 = arith.constant 0 : index
    %c0_3 = arith.constant 0 : index
    %3 = vector.load %arg3[%c0_2, %c0_3] : memref<32x32xbf16, #tpu.memory_space<vmem>>, vector<32x32xbf16>
    %cst = arith.constant dense<0.000000e+00> : vector<8x32xf32>
    %4 = tpu.matmul %2, %3, %cst {dimension_numbers = #tpu.dot_dimension_numbers<[1], [0], [0], [1], [0, 0, 1, 1], [], []>} : vector<8x32xbf16>, vector<32x32xbf16>, vector<8x32xf32> -> vector<8x32xf32>
    %c0_4 = arith.constant 0 : index
    %c0_5 = arith.constant 0 : index
    %5 = vector.load %arg4[%c0_4, %c0_5] : memref<1x32xf32, #tpu.memory_space<vmem>>, vector<1x32xf32>
    %6 = vector.shape_cast %5 : vector<1x32xf32> to vector<32xf32>
    %7 = vector.shape_cast %6 : vector<32xf32> to vector<1x32xf32>
    %8 = vector.broadcast %7 : vector<1x32xf32> to vector<8x32xf32>
    %9 = arith.addf %4, %8 : vector<8x32xf32>
    %cst_6 = arith.constant 0.353553385 : f32
    %10 = vector.broadcast %cst_6 : f32 to vector<8x32xf32>
    %11 = arith.mulf %9, %10 : vector<8x32xf32>
    %12 = arith.truncf %11 : vector<8x32xf32> to vector<8x32xbf16>
    %c0_7 = arith.constant 0 : index
    %c0_8 = arith.constant 0 : index
    %c0_9 = arith.constant 0 : index
    %13 = vector.load %arg5[%c0_7, %c0_8, %c0_9] : memref<1x8x32xbf16, #tpu.memory_space<vmem>>, vector<1x8x32xbf16>
    %14 = vector.shape_cast %13 : vector<1x8x32xbf16> to vector<8x32xbf16>
    %15 = vector.shape_cast %12 : vector<8x32xbf16> to vector<1x8x32xbf16>
    tpu.vector_store %arg5[%c0_7, %c0_8, %c0_9], %15 {strides = array<i32>} : memref<1x8x32xbf16, #tpu.memory_space<vmem>>, vector<1x8x32xbf16>,
    return
  }
  func.func @transform_0(%arg0: i32, %arg1: i32) -> (i32, i32, i32) {
    %c0_i32 = arith.constant 0 : i32
    %c0_i32_0 = arith.constant 0 : i32
    return %arg0, %arg1, %c0_i32 : i32, i32, i32
  }
  func.func @transform_1(%arg0: i32, %arg1: i32) -> (i32, i32) {
    %c0_i32 = arith.constant 0 : i32
    %c0_i32_0 = arith.constant 0 : i32
    %c0_i32_1 = arith.constant 0 : i32
    return %c0_i32, %c0_i32_0 : i32, i32
  }
  func.func @transform_2(%arg0: i32, %arg1: i32) -> (i32, i32) {
    %c0_i32 = arith.constant 0 : i32
    %c0_i32_0 = arith.constant 0 : i32
    %c0_i32_1 = arith.constant 0 : i32
    return %c0_i32, %c0_i32_0 : i32, i32
  }
  func.func @transform_3(%arg0: i32, %arg1: i32) -> (i32, i32, i32) {
    %c0_i32 = arith.constant 0 : i32
    %c0_i32_0 = arith.constant 0 : i32
    return %arg0, %arg1, %c0_i32 : i32, i32, i32
  }
}

</mosaic_0001>

<bundles_post_ra>
// kernel: tpu_custom_call.1
= control target key start
LH: loop header
LB: loop body
LE: loop exit
PB: predicated region body
PF: predicated region fallthrough
CT: control target
= control target key end

     0   :  { %8 = vsyncpa [#allocation3], 0  ;;  %s897_s0 = inlined_call_operand.hbm [shape: f32[2,8,32], index: 0, kind: input, shape index: {}]   ;;  %s898_s1 = inlined_call_operand.hbm [shape: bf16[32,32], index: 1, kind: input, shape index: {}]   ;;  %s899_s2 = inlined_call_operand.vmem [shape: f32[1,32], index: 2, kind: input, shape index: {}]   ;;  %s900_s3 = inlined_call_operand.hbm [shape: bf16[2,8,32], index: 3, kind: output, shape index: {}]  }
   0x1   :  { %10 = vsyncpa [#allocation3 + $0x1], 0 }
   0x2   :  { %11 = vsyncpa [#allocation6], 0 }
   0x3   :  { %12 = vsyncpa [#allocation4], 0 }
   0x4   :  { %14 = vsyncpa [#allocation4 + $0x1], 0  ;;  %s679_s12 = smov 0   ;;  %s681_s13 = smov 0  }
   0x5   :  { %s683_s14 = smov 0   ;;  %s685_s15 = smov 0  }
   0x6   :  { %s687_s16 = smov 0   ;;  %s689_s17 = smov 0  }
   0x7 LB: > { %s397_s18 = sadd.s32 4294967295, %s650_s17   ;;  %s398_s19 = sadd.s32 4294967294, %s650_s17   ;;  %s650_s17 = sphi %s689_s17, %s20_s17   ;;  %s646_s16 = sphi %s687_s16, %s924_s16   ;;  %s642_s15 = sphi %s685_s15, %s923_s15   ;;  %s638_s14 = sphi %s683_s14, %s922_s14   ;;  %s634_s13 = sphi %s681_s13, %s921_s13   ;;  %s630_s12 = sphi %s679_s12, %s920_s12  }
   0x8   : > { %p54_p0 = scmp.ne.s32.totalorder %s634_s13, %s630_s12  ;;  %p713_p1 = scmp.eq.s32.totalorder %s397_s18, 0 }
   0x9   : > { %p717_p2 = scmp.eq.s32.totalorder %s397_s18, 1  ;;  %p128_p3 = scmp.eq.s32.totalorder %s398_s19, 1 }
   0xa   : > { %s905_s20 = scalar_select %p713_p1, 1, 0 }
   0xb   : > { %s906_s21 = scalar_select %p717_p2, 1, 0 }
   0xc   : > { %p723_p4 = por %p713_p1, %p54_p0  ;;  %p399_p5 = scmp.ge.s32.totalorder %s650_s17, 1 }
   0xd   : > { %p728_p6 = por %p128_p3, %p54_p0  ;;  %p135_p7 = scmp.lt.s32.totalorder %s650_s17, 3 }
   0xe   : > { %s907_s22 = scalar_select %p723_p4, 1, 0 }
   0xf   : > { %s908_s23 = scalar_select %p728_p6, 1, 0 }
  0x10   : > { %p733_p8 = pnand %p399_p5, %p135_p7  ;;  %s652_s25 = smov [#allocation5]  }
  0x11   : > { %s147_s26 = sshll.u32 %s652_s25, 4  ;;  %s32_s28 = sadd.s32 1, %s646_s16  ;;  %s148_s26 = int_to_ptr.vmem [resolvable:$true] %s147_s26 }
  0x12   : > { %s909_s24 = scalar_select %p733_p8, 1, 0 }
  0x13   : > { %p435_p9 = pneg %p733_p8  ;;  %s506_s4 = scalar_lea.hbm %s898_s1, 256 }
  0x14   : > { %p507_p12 = scmp.ne.s32.totalorder %s898_s1, %s506_s4  ;;  %p513_p5 = scmp.lt.u32.totalorder %s506_s4, %s898_s1 }
  0x15   : > { %p742_p11 = pnand %p435_p9, %p713_p1 }
  0x17   : > { %p508_p13 = pneg %p742_p11 }
  0x19   : > { %p509_p0 = pnand %p508_p13, %p507_p12 }
  0x1b   : > { %p510_p3 = pneg %p509_p0 }
  0x1d   : > { %p515_p7 = pnand %p513_p5, %p510_p3 }
  0x1f   : > { %518 = shalt.err (!%p515_p7)
}
  0x20   : > { %s519_s9 = scalar_lea.vmem %s148_s26, 256  ;;  %p527_p1 = scmp.lt.s32.totalorder %s148_s26, %s148_s26 }
  0x21   : > { %p520_p9 = scmp.ne.s32.totalorder %s148_s26, %s519_s9  ;;  %p528_p4 = scmp.lt.s32.totalorder %s519_s9, %s519_s9 }
  0x23   : > { %p522_p10 = pnand %p520_p9, %p508_p13  ;;  %p529_p8 = por %p528_p4, %p527_p1 }
  0x25   : > { %p523_p6 = pneg %p522_p10 }
  0x27   : > { %p530_p2 = pnand %p529_p8, %p523_p6 }
  0x29   : > { %533 = shalt.err (!%p530_p2)
}
  0x2a   : > { %s653_s10 = smov 64   ;;  %s654_s11 = smov 4  }
  0x2b   : > { %438 = dma.hbm_to_vmem [thread:$0]  (!%p742_p11), %s898_s1, 256, %s148_s26, [#allocation6], %s653_s10, %s653_s10, %s654_s11  }
  0x2c   : > { %p34_p1 = scmp.ge.s32.totalorder %s32_s28, 2  ;;  %s41_s25 = sadd.s32 1, %s638_s14 }
  0x2d   : > { %p48_p2 = scmp.ne.s32.totalorder %s638_s14, %s634_s13  ;;  %p49_p4 = scmp.eq.s32.totalorder %s650_s17, 0 }
  0x2e   : > { %s926_s28 = smov (%p34_p1, %s32_s28), 0  ;;  %p912_p8 = scmp.ne.s32.totalorder %s906_s21, 0 }
  0x2f   : > { %p769_p6 = por %p49_p4, %p48_p2  ;;  %s36_s27 = ssub.s32 %s646_s16, %s926_s28 }
  0x30   : > { %p775_p10 = por %p912_p8, %p48_p2  ;;  %p448_p12 = scmp.lt.s32.totalorder %s650_s17, 2 }
  0x31   : > { %p39_p11 = scmp.eq.s32.totalorder %s36_s27, 0  ;;  %s164_s26 = sand.u32 1, %s638_s14  }
  0x32   : > { %s402_s4 = sshll.u32 %s164_s26, 3  ;;  %s403_s6 = sshll.u32 %s646_s16, 7 }
  0x33   : > { %s784_s5 = scalar_select %p39_p11, %s638_s14, %s41_s25  }
  0x34   : > { %s790_s9 = scalar_lea.hbm %s897_s0, %s403_s6  ;;  %s168_s21 = scalar_lea.vmem [#allocation2], %s402_s4 }
  0x35   : > { %s176_s10 = sshll.u32 %s168_s21, 4  ;;  %p796_p13 = pnand %p448_p12, %p769_p6  ;;  %s792_s10 = int_to_ptr.vmem [resolvable:$true] %s176_s10 }
  0x36   : > { %s165_s18 = scalar_lea.sflag [#allocation3], %s164_s26  ;;  %s534_s19 = scalar_lea.hbm %s790_s9, 128 }
  0x37   : > { %p535_p0 = scmp.ne.s32.totalorder %s790_s9, %s534_s19  ;;  %p536_p3 = pneg %p796_p13 }
  0x38   : > { %s539_s4 = scalar_lea.hbm %s897_s0, 256  ;;  %p540_p9 = scmp.lt.u32.totalorder %s790_s9, %s897_s0 }
  0x39   : > { %p537_p5 = pnand %p536_p3, %p535_p0  ;;  %p541_p1 = scmp.lt.u32.totalorder %s539_s4, %s534_s19 }
  0x3a   : > { %p543_p4 = scmp.lt.u32.totalorder %s534_s19, %s790_s9 }
  0x3b   : > { %p538_p7 = pneg %p537_p5  ;;  %p542_p2 = por %p541_p1, %p540_p9 }
  0x3d   : > { %p544_p6 = por %p543_p4, %p542_p2 }
  0x3f   : > { %p545_p8 = pnand %p544_p6, %p538_p7 }
  0x41   : > { %548 = shalt.err (!%p545_p8)
}
  0x42   : > { %s549_s26 = scalar_lea.vmem %s792_s10, 128  ;;  %s655_s7 = smov [#allocation2]  }
  0x43   : > { %p550_p12 = scmp.ne.s32.totalorder %s792_s10, %s549_s26  ;;  %s554_s8 = sshll.u32 %s655_s7, 4  ;;  %s555_s8 = int_to_ptr.vmem [resolvable:$false] %s554_s8 }
  0x44   : > { %s556_s21 = scalar_lea.vmem %s555_s8, 256  ;;  %p557_p5 = scmp.lt.s32.totalorder %s792_s10, %s555_s8 }
  0x45   : > { %p552_p11 = pnand %p550_p12, %p536_p3  ;;  %p558_p9 = scmp.lt.s32.totalorder %s556_s21, %s549_s26 }
  0x47   : > { %p553_p0 = pneg %p552_p11  ;;  %p559_p1 = por %p558_p9, %p557_p5 }
  0x49   : > { %p560_p2 = pnand %p559_p1, %p553_p0 }
  0x4b   : > { %563 = shalt.err (!%p560_p2)
}
  0x4c   : > { %442 = dma.hbm_to_vmem [thread:$0]  (!%p796_p13), %s790_s9, 128, %s792_s10, %s165_s18  }
  0x4d   : > { %p915_p7 = scmp.ne.s32.totalorder %s909_s24, 0 }
  0x4e   : > { %s828_s19 = sand.u32 (!%p915_p7), 1, %s634_s13   ;;  %p916_p3 = scmp.ne.s32.totalorder (!%p915_p7), %s907_s22, 0 }
  0x4f   : > { %185 = sbr.rel (%p915_p7) target bundleno = 331 (0x14b), region = 32  ;;  %s405_s25 = sshll.u32 (!%p915_p7), %s828_s19, 3 }
  0x50   : > { %s188_s27 = scalar_lea.sflag (!%p915_p7), [#allocation3], %s828_s19  ;;  %s191_s4 = scalar_lea.vmem (!%p915_p7), [#allocation2], %s405_s25 }
  0x56   : > { %617 = dma.done.wait (%p916_p3), %s188_s27, 128  }
  0x57   : > { %619 = vsyncadd (%p916_p3), %s188_s27, 4294967168  ;;  %p917_p4 = scmp.ne.s32.totalorder %s905_s20, 0 }
  0x59   : > { %621 = dma.done.wait (%p917_p4), [#allocation6], 256  }
  0x5a   : > { %623 = vsyncadd (%p917_p4), [#allocation6], 4294967040  ;;  %v656_v0 = vmov 0.0   ;;  %vm657_vm0 = vmmov 0   ;;  %v504_v1 = vld [vmem:[#allocation5] sm:$0xff]   ;;  %v505_v2 = vld [vmem:[#allocation5 + $0x8] sm:$0xff]  }
  0x5b   : > { %419 = vmatprep.subr.bf16.mxu0 %v656_v0  ;;  %423 = vmatprep.mubr.msk.bf16.mxu0 %vm657_vm0, %v656_v0  ;;  %v219_v3 = vld [vmem:[%s191_s4] sm:$0xff]  ;;  %vm244_vm1 = vcmask 261120   ;;  %s407_s22 = sshll.u32 %s828_s19, 2  ;;  %s413_s20 = sshll.u32 %s642_s15, 6  ;;  %vm290_vm2 = vcmask 257024  }
  0x5c   : > { %420 = vmatpush3.bf16.msra.mxu0 %v504_v1  ;;  %v220_v4 = vpack.c.bf16 %v219_v3, %v219_v3  ;;  %v408_v5 = vld [vmem:[%s899_s2] ss:$0 sm:$0xff]  ;;  %s217_s10 = scalar_lea.vmem [#allocation7], %s407_s22  ;;  %s848_s6 = scalar_lea.hbm %s900_s3, %s413_s20 }
  0x5d   : > { %421 = vmatprep.subr.bf16.mxu0 %v656_v0  ;;  %s307_s11 = sshll.u32 %s217_s10, 4  ;;  %s293_s26 = scalar_lea.sflag [#allocation4], %s828_s19  ;;  %s850_s11 = int_to_ptr.vmem [resolvable:$true] %s307_s11 }
  0x5e   : > { %s564_s7 = scalar_lea.vmem %s850_s11, 64  ;;  %s658_s15 = smov [#allocation7]  }
  0x5f   : > { %p565_p13 = scmp.ne.s32.totalorder %s850_s11, %s564_s7  ;;  %s568_s8 = sshll.u32 %s658_s15, 4  ;;  %s569_s8 = int_to_ptr.vmem [resolvable:$false] %s568_s8 }
  0x60   : > { %422 = vmatpush3.bf16.msra.mxu0 %v505_v2  ;;  %s570_s21 = scalar_lea.vmem %s569_s8, 128  ;;  %p571_p12 = scmp.lt.s32.totalorder %s850_s11, %s569_s8 }
  0x61   : > { %p566_p6 = pnand %p565_p13, %p775_p10  ;;  %p572_p11 = scmp.lt.s32.totalorder %s570_s21, %s564_s7 }
  0x63   : > { %424 = vmatmul.mubr.msk.bf16.vlgmr.msra.gmra.mrb[0].mxu0 %vm244_vm1, %v220_v4  ;;  %p567_p8 = pneg %p566_p6  ;;  %p573_p0 = por %p572_p11, %p571_p12 }
  0x65   : > { %p574_p5 = pnand %p573_p0, %p567_p8 }
 0x136   : > { %v282_v6 = vpop.f32.mrb[0].mxu0 }
 0x137   : > { %v283_v7 = vadd.f32 %v408_v5, %v282_v6  ;;  %v425_v8 = vpop.f32.mrb[1].mxu0 }
 0x138   : > { %v285_v9 = vpop.f32.mrb[2].mxu0 }
 0x139   : > { %v288_v10 = vmul.f32 0.35355338, %v283_v7  ;;  %v426_v11 = vpop.f32.mrb[3].mxu0 }
 0x13b   : > { %v289_v12 = vpack.c.bf16 %v288_v10, %v288_v10 }
 0x13d   : > { %291 = vst.msk [vmem:[%s217_s10] sm:$0xf] %vm290_vm2, %v289_v12 }
 0x13e   : > { %577 = shalt.err (!%p574_p5)
}
 0x13f   : > { %s578_s19 = scalar_lea.hbm %s848_s6, 64  ;;  %s582_s4 = scalar_lea.hbm %s900_s3, 128 }
 0x140   : > { %p579_p9 = scmp.ne.s32.totalorder %s848_s6, %s578_s19  ;;  %p583_p7 = scmp.lt.u32.totalorder %s848_s6, %s900_s3 }
 0x141   : > { %p584_p3 = scmp.lt.u32.totalorder %s582_s4, %s578_s19  ;;  %p586_p13 = scmp.lt.u32.totalorder %s578_s19, %s848_s6 }
 0x142   : > { %p580_p1 = pnand %p579_p9, %p775_p10 }
 0x143   : > { %p585_p4 = por %p584_p3, %p583_p7 }
 0x144   : > { %p581_p2 = pneg %p580_p1 }
 0x145   : > { %p587_p6 = por %p586_p13, %p585_p4 }
 0x147   : > { %p588_p8 = pnand %p587_p6, %p581_p2 }
 0x149   : > { %591 = shalt.err (!%p588_p8)
}
 0x14a   : > { %433 = dma.vmem_to_hbm [thread:$0]  (%p775_p10), %s850_s11, 64, %s848_s6, %s293_s26  }
 0x14b PF: > { %s319_s9 = sand.u32 1, %s630_s12   ;;  %p918_p12 = scmp.ne.s32.totalorder %s908_s23, 0 }
 0x14c   : > { %p919_p11 = scmp.ge.s32.totalorder %s650_s17, 2  ;;  %s320_s20 = scalar_lea.sflag [#allocation4], %s319_s9 }
 0x14e   : > { %p444_p0 = pnand %p919_p11, %p918_p12 }
 0x150   : > { %625 = dma.done.wait (!%p444_p0), %s320_s20, 64  }
 0x151   : > { %627 = vsyncadd (!%p444_p0), %s320_s20, 4294967232  ;;  %s20_s17 = sadd.s32 1, %s650_s17   ;;  %s920_s12 = smov %s634_s13 }
 0x152   : > { %p17_p5 = scmp.ge.s32.totalorder %s20_s17, 4   ;;  %s921_s13 = smov %s638_s14 }
 0x153   : > { %s922_s14 = smov %s784_s5  ;;  %s923_s15 = smov %s646_s16 }
 0x154   : > { %s924_s16 = smov %s926_s28  ;;  %19 = sbr.rel (!%p17_p5) target bundleno = 7 (0x7), region = 81 }
 0x15b   :  { %325 = vsyncpa [#allocation3], 1 }
 0x15c   :  { %327 = vsyncpa [#allocation3 + $0x1], 1 }
 0x15d   :  { %328 = vsyncpa [#allocation6], 1 }
 0x15e   :  { %329 = vsyncpa [#allocation4], 1 }
 0x15f   :  { %331 = vsyncpa [#allocation4 + $0x1], 1 }

</bundles_post_ra>
